<compile_context>
chip_gen: v6e
topology: v6e:2x2x1
jax: 0.10.0
libtpu: 0.0.40
codegen_flags: <defaults>
</compile_context>

<pallas_src>
import functools

import jax
import jax.numpy as jnp
from jax import lax
from jax.experimental import pallas as pl
from jax.experimental.pallas import tpu as pltpu

LN_EPS = 1e-5
_LANE = 128        # vreg / MXU lane width
_MXU_TILE = 256    # MXU tile on v6e/v7x (also a multiple of the 128-wide v5e MXU)


# ----------------------------------------------------------------------------
# small helpers
# ----------------------------------------------------------------------------
def _round_up(x, m):
    return ((x + m - 1) // m) * m


def _round_down(x, m):
    return (x // m) * m


def _min_row_tile(*itemsizes):
    """Minimum sublane-aligned row tile: 8 rows for 4-byte dtypes,
    16 for 2-byte, 32 for 1-byte (packing tile)."""
    return max(8 * (4 // max(min(int(i), 4), 1)) for i in itemsizes)


def _vmem_capacity_bytes():
    """Per-core VMEM capacity; conservative 64 MiB (v7x) if the query fails."""
    try:
        info = pltpu.get_tpu_info()
        for name in ("vmem_capacity_bytes", "vmem_size_bytes", "vmem_bytes"):
            v = getattr(info, name, None)
            if v:
                return int(v)
    except Exception:
        pass
    return 64 * 1024 * 1024


@functools.lru_cache(maxsize=None)
def _buffered_one_supported():
    """Probe whether pipeline_mode=pl.Buffered(1) (single-buffering of
    grid-invariant operands) lowers on this backend; fall back if not."""
    try:
        def _probe(x_ref, o_ref):
            o_ref[...] = x_ref[...]
        out = pl.pallas_call(
            _probe,
            out_shape=jax.ShapeDtypeStruct((8, _LANE), jnp.float32),
            grid=(1,),
            in_specs=[pl.BlockSpec((8, _LANE), lambda i: (0, 0),
                                   pipeline_mode=pl.Buffered(1))],
            out_specs=pl.BlockSpec((8, _LANE), lambda i: (0, 0)),
        )(jnp.zeros((8, _LANE), jnp.float32))
        jax.block_until_ready(out)
        return True
    except Exception:
        return False


def _const_spec(shape, grid_rank, single_buf):
    """BlockSpec for a grid-invariant (VMEM-resident) operand."""
    idx = (lambda i: (0, 0)) if grid_rank == 1 else (lambda i, j: (0, 0))
    if single_buf:
        return pl.BlockSpec(shape, idx, pipeline_mode=pl.Buffered(1))
    return pl.BlockSpec(shape, idx)


# ----------------------------------------------------------------------------
# VMEM accounting / tile selection
# ----------------------------------------------------------------------------
def _per_row_bytes_simple(D, n_act_in, act_isz, res_isz):
    # streamed blocks, double-buffered: activation inputs + mixed out + residual out
    streamed = 2 * D * (n_act_in * act_isz + act_isz + res_isz)
    # in-kernel fp32 temporaries (x, centred, normed, matmul accumulator)
    temps = 4 * D * 4
    return streamed + temps


def _per_row_bytes_tiled(D, out_tile, n_act_in, act_isz, res_isz, w_isz):
    # streamed: activation inputs + residual out (full D, double-buffered)
    #           + mixed-out blocks (out_tile wide, double-buffered)
    streamed = 2 * D * (n_act_in * act_isz + res_isz) + 2 * out_tile * act_isz
    # resident normed scratch + fp32 LN temporaries + per-step fp32 accumulator
    scratch = D * w_isz
    temps = 3 * D * 4 + out_tile * 4
    return streamed + scratch + temps


def _choose_out_tile(D, w_isz, w_budget):
    """Largest multiple-of-128 divisor of D whose double-buffered (D, tn)
    weight block fits w_budget; None if no such tiling exists."""
    best = None
    tn = _LANE
    while tn < D:
        if D % tn == 0 and 2 * D * tn * w_isz <= w_budget:
            best = tn
        tn += _LANE
    return best


def _choose_row_tile(n_rows, avail_bytes, per_row, min_rows):
    """Largest MXU-aligned row tile whose streamed working set fits."""
    tile = max(avail_bytes // max(per_row, 1), min_rows)
    tile = min(tile, 1024)
    if tile >= _MXU_TILE:
        tile = _round_down(tile, _MXU_TILE)   # MXU-aligned, keeps stores unmasked
    elif tile >= _LANE:
        tile = _LANE
    else:
        tile = max(_round_down(tile, min_rows), min_rows)
    # Let the "parallel" row axis split across >= 2 TensorCores (v7x megacore).
    if n_rows > _LANE:
        tile = min(tile, max(_LANE, _round_up(pl.cdiv(n_rows, 2), _LANE)))
    # Never use a block taller than the (row-aligned) input.
    tile = min(tile, max(min_rows, _round_down(n_rows, min_rows)))
    return int(tile)


# ----------------------------------------------------------------------------
# kernels
# ----------------------------------------------------------------------------
def _layernorm_f32(res, lnw_ref, lnb_ref):
    """LayerNorm with fp32 statistics; returns the fp32 normalized rows."""
    x = res.astype(jnp.float32)
    mean = jnp.mean(x, axis=-1, keepdims=True)
    cent = x - mean
    var = jnp.mean(cent * cent, axis=-1, keepdims=True)
    inv = lax.rsqrt(var + LN_EPS)
    return (cent * inv * lnw_ref[...].astype(jnp.float32)
            + lnb_ref[...].astype(jnp.float32))


def _make_fused_kernel(has_residual):
    """add + LayerNorm + dense mixer; the whole D x D weight stays in VMEM."""
    def kernel(*refs):
        if has_residual:
            h_ref, r_ref, lnw_ref, lnb_ref, w_ref, mb_ref, y_ref, res_ref = refs
            res = r_ref[...] + h_ref[...]
        else:
            h_ref, lnw_ref, lnb_ref, w_ref, mb_ref, y_ref, res_ref = refs
            res = h_ref[...]
        res_ref[...] = res.astype(res_ref.dtype)
        normed = _layernorm_f32(res, lnw_ref, lnb_ref)
        acc = jnp.dot(normed.astype(w_ref.dtype), w_ref[...],
                      preferred_element_type=jnp.float32)
        y_ref[...] = (acc + mb_ref[...].astype(jnp.float32)).astype(y_ref.dtype)
    return kernel


def _make_tiled_kernel(has_residual):
    """add + LayerNorm + dense mixer with the mixer output dim tiled.

    Grid = (row_tiles, D // out_tile).  LayerNorm runs once per row tile
    (at j == 0) into a VMEM scratch reused for every output tile; weight VMEM
    is bounded to 2 * D * out_tile (same effect as K-tiling the contraction)."""
    def kernel(*refs):
        if has_residual:
            (h_ref, r_ref, lnw_ref, lnb_ref, w_ref, mb_ref,
             y_ref, res_ref, normed_scr) = refs
        else:
            (h_ref, lnw_ref, lnb_ref, w_ref, mb_ref,
             y_ref, res_ref, normed_scr) = refs
            r_ref = None

        @pl.when(pl.program_id(1) == 0)
        def _():
            res = h_ref[...] if r_ref is None else r_ref[...] + h_ref[...]
            res_ref[...] = res.astype(res_ref.dtype)
            normed_scr[...] = _layernorm_f32(res, lnw_ref, lnb_ref
                                             ).astype(normed_scr.dtype)

        acc = jnp.dot(normed_scr[...], w_ref[...],
                      preferred_element_type=jnp.float32)
        y_ref[...] = (acc + mb_ref[...].astype(jnp.float32)).astype(y_ref.dtype)
    return kernel


# ----------------------------------------------------------------------------
# wrapper
# ----------------------------------------------------------------------------
def block_forward(hidden, residual, ln_w, ln_b, mix_w, mix_b, *,
                  matmul_in_bf16=False, _force_out_tile=None):
    """Pallas implementation of Block.forward.

    hidden, residual: (B, L, D); ln_w, ln_b, mix_b: (D,); mix_w: (D, D).
    Returns (mixed, residual_out); mixed in hidden.dtype, residual_out in the
    promoted dtype of (hidden, residual) as in PyTorch's `residual + hidden`.
    """
    B, L, D = hidden.shape
    N = B * L
    has_res = residual is not None
    out_dtype = hidden.dtype
    res_dtype = (jnp.result_type(hidden.dtype, residual.dtype)
                 if has_res else hidden.dtype)

    if matmul_in_bf16 and jnp.dtype(mix_w.dtype) == jnp.dtype(jnp.float32):
        # MXU runs bf16 operands much faster; the fp32 accumulator is kept.
        mix_w = mix_w.astype(jnp.bfloat16)

    act_isz = jnp.dtype(hidden.dtype).itemsize
    res_isz = jnp.dtype(res_dtype).itemsize
    w_isz = jnp.dtype(mix_w.dtype).itemsize
    n_act_in = 2 if has_res else 1
    min_rows = _min_row_tile(act_isz, res_isz)

    # Generation-aware VMEM budget (~96 MiB on 128-MiB v5e/v6e, ~48 MiB on v7x).
    cap = _vmem_capacity_bytes()
    budget = (cap * 3) // 4

    single_buf = _buffered_one_supported()
    w_bufs = 1 if single_buf else 2
    params_bytes = 6 * D * 4 * 2          # ln_w, ln_b, mix_b (tiny, upper bound)

    h2 = hidden.reshape(N, D)
    r2 = residual.reshape(N, D) if has_res else None

    # Pathological tiny-N case only: pad up to one sublane-packing tile
    # (<= 31 rows).  All other shapes rely on Pallas partial-block clipping.
    n_rows = N
    if N < min_rows:
        h2 = jnp.pad(h2, ((0, min_rows - N), (0, 0)))
        if r2 is not None:
            r2 = jnp.pad(r2, ((0, min_rows - N), (0, 0)))
        n_rows = min_rows

    lnw2 = ln_w.reshape(1, D)
    lnb2 = ln_b.reshape(1, D)
    mb2 = mix_b.reshape(1, D)

    # ---- choose path: resident D x D weight vs output-dim-tiled weight ----
    per_row_simple = _per_row_bytes_simple(D, n_act_in, act_isz, res_isz)
    w_resident = w_bufs * D * D * w_isz
    want_rows = min(_MXU_TILE, _round_up(n_rows, min_rows))
    simple_ok = (w_resident + params_bytes + want_rows * per_row_simple) <= budget

    out_tile = _force_out_tile
    if out_tile is None and not simple_ok:
        out_tile = _choose_out_tile(D, w_isz, budget // 4)
    if out_tile is not None:
        assert D % out_tile == 0 and out_tile % _LANE == 0
    # TODO(synk): if D is not a multiple of 128 and the weight overflows the
    # VMEM budget, we still fall back to the resident-weight path.

    # Alias the residual input (or hidden when residual is None) with res_out.
    if has_res:
        io_alias = ({1: 1} if jnp.dtype(r2.dtype) == jnp.dtype(res_dtype) else {})
    else:
        io_alias = {0: 1}

    out_shape = (jax.ShapeDtypeStruct((n_rows, D), out_dtype),
                 jax.ShapeDtypeStruct((n_rows, D), res_dtype))

    if out_tile is None:
        # ------------- simple fused path (weight VMEM-resident) -------------
        avail = budget - w_resident - params_bytes
        tile_n = _choose_row_tile(n_rows, avail, per_row_simple, min_rows)
        grid = (pl.cdiv(n_rows, tile_n),)

        row_spec = pl.BlockSpec((tile_n, D), lambda i: (i, 0))
        vec_spec = _const_spec((1, D), 1, single_buf)
        w_spec = _const_spec((D, D), 1, single_buf)

        in_specs = ([row_spec, row_spec] if has_res else [row_spec])
        in_specs += [vec_spec, vec_spec, w_spec, vec_spec]
        out_specs = (row_spec, row_spec)

        est = w_resident + params_bytes + tile_n * per_row_simple
        scratch = []
        kernel = _make_fused_kernel(has_res)
        sem = ("parallel",)
    else:
        # ------------- output-dim-tiled path (large D / v7x) ----------------
        w_block = 2 * D * out_tile * w_isz
        per_row_tiled = _per_row_bytes_tiled(D, out_tile, n_act_in,
                                             act_isz, res_isz, w_isz)
        avail = budget - w_block - params_bytes
        tile_n = _choose_row_tile(n_rows, avail, per_row_tiled, min_rows)
        grid = (pl.cdiv(n_rows, tile_n), D // out_tile)

        row_spec = pl.BlockSpec((tile_n, D), lambda i, j: (i, 0))
        vec_spec = _const_spec((1, D), 2, single_buf)
        w_spec = pl.BlockSpec((D, out_tile), lambda i, j: (0, j))
        mb_spec = pl.BlockSpec((1, out_tile), lambda i, j: (0, j))
        y_spec = pl.BlockSpec((tile_n, out_tile), lambda i, j: (i, j))

        in_specs = ([row_spec, row_spec] if has_res else [row_spec])
        in_specs += [vec_spec, vec_spec, w_spec, mb_spec]
        out_specs = (y_spec, row_spec)

        est = w_block + params_bytes + tile_n * per_row_tiled
        scratch = [pltpu.VMEM((tile_n, D), mix_w.dtype)]
        kernel = _make_tiled_kernel(has_res)
        sem = ("parallel", "arbitrary")

    operands = ((h2, r2) if has_res else (h2,)) + (lnw2, lnb2, mix_w, mb2)

    vmem_limit = int(min(max(est * 5 // 4, 16 * 1024 * 1024), (cap * 7) // 8))
    cparams = pltpu.CompilerParams(dimension_semantics=sem,
                                   vmem_limit_bytes=vmem_limit)

    mixed, res_out = pl.pallas_call(
        kernel,
        out_shape=out_shape,
        grid=grid,
        in_specs=in_specs,
        out_specs=out_specs,
        scratch_shapes=scratch,
        input_output_aliases=io_alias,
        compiler_params=cparams,
    )(*operands)

    if n_rows != N:
        mixed = mixed[:N]
        res_out = res_out[:N]
    return mixed.reshape(B, L, D), res_out.reshape(B, L, D)


# ----------------------------------------------------------------------------
# pure-JAX reference
# ----------------------------------------------------------------------------
def _reference(hidden, residual, ln_w, ln_b, mix_w, mix_b):
    res = hidden if residual is None else residual + hidden
    x = res.astype(jnp.float32)
    mean = jnp.mean(x, axis=-1, keepdims=True)
    var = jnp.mean((x - mean) ** 2, axis=-1, keepdims=True)
    normed = (x - mean) / jnp.sqrt(var + LN_EPS) * ln_w + ln_b
    mixed = normed @ mix_w.astype(normed.dtype) + mix_b
    return mixed.astype(hidden.dtype), res


if __name__ == "__main__":
    keys = jax.random.split(jax.random.PRNGKey(0), 10)

    # --- small shapes: batch=2, seq=8, dim=32 (resident-weight path) --------
    B, L, D = 2, 8, 32
    hidden = jax.random.normal(keys[0], (B, L, D), dtype=jnp.float32)
    residual = jax.random.normal(keys[1], (B, L, D), dtype=jnp.float32)
    ln_w = 1.0 + 0.1 * jax.random.normal(keys[2], (D,), dtype=jnp.float32)
    ln_b = 0.1 * jax.random.normal(keys[3], (D,), dtype=jnp.float32)
    mix_w = jax.random.normal(keys[4], (D, D), dtype=jnp.float32) / jnp.sqrt(D)
    mix_b = 0.1 * jax.random.normal(keys[5], (D,), dtype=jnp.float32)

    out_h, out_r = block_forward(hidden, residual, ln_w, ln_b, mix_w, mix_b)
    jax.block_until_ready((out_h, out_r))
    ref_h, ref_r = _reference(hidden, residual, ln_w, ln_b, mix_w, mix_b)
    assert out_h.shape == (B, L, D) and out_r.shape == (B, L, D)
    assert out_h.dtype == hidden.dtype and out_r.dtype == hidden.dtype
    assert jnp.allclose(out_h, ref_h, atol=1e-4, rtol=1e-4)
    assert jnp.allclose(out_r, ref_r, atol=1e-5, rtol=1e-5)

    # --- residual=None (first block) -----------------------------------------
    out_h0, out_r0 = block_forward(hidden, None, ln_w, ln_b, mix_w, mix_b)
    jax.block_until_ready((out_h0, out_r0))
    ref_h0, ref_r0 = _reference(hidden, None, ln_w, ln_b, mix_w, mix_b)
    assert jnp.allclose(out_h0, ref_h0, atol=1e-4, rtol=1e-4)
    assert jnp.allclose(out_r0, ref_r0, atol=1e-5, rtol=1e-5)

    # --- large-D (output-tiled weight) path, forced at a small shape ---------
    D2 = 256
    hidden2 = jax.random.normal(keys[6], (B, L, D2), dtype=jnp.float32)
    residual2 = jax.random.normal(keys[7], (B, L, D2), dtype=jnp.float32)
    ln_w2 = 1.0 + 0.1 * jax.random.normal(keys[8], (D2,), dtype=jnp.float32)
    ln_b2 = jnp.zeros((D2,), jnp.float32)
    mix_w2 = jax.random.normal(keys[9], (D2, D2), dtype=jnp.float32) / jnp.sqrt(D2)
    mix_b2 = jnp.zeros((D2,), jnp.float32)
    out_h2, out_r2 = block_forward(hidden2, residual2, ln_w2, ln_b2,
                                   mix_w2, mix_b2, _force_out_tile=128)
    jax.block_until_ready((out_h2, out_r2))
    ref_h2, ref_r2 = _reference(hidden2, residual2, ln_w2, ln_b2, mix_w2, mix_b2)
    assert jnp.allclose(out_h2, ref_h2, atol=1e-3, rtol=1e-3)
    assert jnp.allclose(out_r2, ref_r2, atol=1e-5, rtol=1e-5)

    print("KERNEL_OK")
</pallas_src>

<mosaic_0001>
module attributes {stable_mosaic.version = 11 : i64} {
  func.func @_probe(%arg0: i32, %arg1: memref<8x128xf32, #tpu.memory_space<vmem>>, %arg2: memref<8x128xf32, #tpu.memory_space<vmem>>) attributes {dimension_semantics = [#tpu.dimension_semantics<arbitrary>], iteration_bounds = array<i64: 1>, scalar_prefetch = 0 : i64, scratch_operands = 0 : i64, tpu.core_type = #tpu.core_type<tc>, window_params = [{pipeline_mode = #tpu.pipeline_mode<synchronous>, transform_indices = @transform_0, window_bounds = array<i64: 8, 128>}, {pipeline_mode = #tpu.pipeline_mode<synchronous>, transform_indices = @transform_1, window_bounds = array<i64: 8, 128>}]} {
    %c0 = arith.constant 0 : index
    %c0_0 = arith.constant 0 : index
    %0 = vector.load %arg1[%c0, %c0_0] : memref<8x128xf32, #tpu.memory_space<vmem>>, vector<8x128xf32>
    %c0_1 = arith.constant 0 : index
    %c0_2 = arith.constant 0 : index
    %1 = vector.load %arg2[%c0_1, %c0_2] : memref<8x128xf32, #tpu.memory_space<vmem>>, vector<8x128xf32>
    tpu.vector_store %arg2[%c0_1, %c0_2], %0 {strides = array<i32>} : memref<8x128xf32, #tpu.memory_space<vmem>>, vector<8x128xf32>,
    return
  }
  func.func @transform_0(%arg0: i32) -> (i32, i32) {
    %c0_i32 = arith.constant 0 : i32
    %c0_i32_0 = arith.constant 0 : i32
    %c0_i32_1 = arith.constant 0 : i32
    return %c0_i32, %c0_i32_0 : i32, i32
  }
  func.func @transform_1(%arg0: i32) -> (i32, i32) {
    %c0_i32 = arith.constant 0 : i32
    %c0_i32_0 = arith.constant 0 : i32
    %c0_i32_1 = arith.constant 0 : i32
    return %c0_i32, %c0_i32_0 : i32, i32
  }
}

module attributes {stable_mosaic.version = 11 : i64} {
  func.func @kernel(%arg0: i32, %arg1: memref<16x32xf32, #tpu.memory_space<vmem>>, %arg2: memref<16x32xf32, #tpu.memory_space<vmem>>, %arg3: memref<1x32xf32, #tpu.memory_space<vmem>>, %arg4: memref<1x32xf32, #tpu.memory_space<vmem>>, %arg5: memref<32x32xf32, #tpu.memory_space<vmem>>, %arg6: memref<1x32xf32, #tpu.memory_space<vmem>>, %arg7: memref<16x32xf32, #tpu.memory_space<vmem>>, %arg8: memref<16x32xf32, #tpu.memory_space<vmem>>) attributes {dimension_semantics = [#tpu.dimension_semantics<parallel>], iteration_bounds = array<i64: 1>, scalar_prefetch = 0 : i64, scratch_operands = 0 : i64, tpu.core_type = #tpu.core_type<tc>, window_params = [{transform_indices = @transform_0, window_bounds = array<i64: 16, 32>}, {transform_indices = @transform_1, window_bounds = array<i64: 16, 32>}, {pipeline_mode = #tpu.pipeline_mode<synchronous>, transform_indices = @transform_2, window_bounds = array<i64: 1, 32>}, {pipeline_mode = #tpu.pipeline_mode<synchronous>, transform_indices = @transform_3, window_bounds = array<i64: 1, 32>}, {pipeline_mode = #tpu.pipeline_mode<synchronous>, transform_indices = @transform_4, window_bounds = array<i64: 32, 32>}, {pipeline_mode = #tpu.pipeline_mode<synchronous>, transform_indices = @transform_5, window_bounds = array<i64: 1, 32>}, {transform_indices = @transform_6, window_bounds = array<i64: 16, 32>}, {transform_indices = @transform_7, window_bounds = array<i64: 16, 32>}]} {
    %c0 = arith.constant 0 : index
    %c0_0 = arith.constant 0 : index
    %0 = vector.load %arg2[%c0, %c0_0] : memref<16x32xf32, #tpu.memory_space<vmem>>, vector<16x32xf32>
    %c0_1 = arith.constant 0 : index
    %c0_2 = arith.constant 0 : index
    %1 = vector.load %arg1[%c0_1, %c0_2] : memref<16x32xf32, #tpu.memory_space<vmem>>, vector<16x32xf32>
    %2 = arith.addf %0, %1 : vector<16x32xf32>
    %c0_3 = arith.constant 0 : index
    %c0_4 = arith.constant 0 : index
    %3 = vector.load %arg8[%c0_3, %c0_4] : memref<16x32xf32, #tpu.memory_space<vmem>>, vector<16x32xf32>
    tpu.vector_store %arg8[%c0_3, %c0_4], %2 {strides = array<i32>} : memref<16x32xf32, #tpu.memory_space<vmem>>, vector<16x32xf32>,
    %cst = arith.constant dense<0.000000e+00> : vector<16xf32>
    %4 = vector.multi_reduction <add>, %2, %cst [1] : vector<16x32xf32> to vector<16xf32>
    %5 = vector.shape_cast %4 : vector<16xf32> to vector<16x1xf32>
    %cst_5 = arith.constant 3.200000e+01 : f32
    %6 = vector.broadcast %cst_5 : f32 to vector<16x1xf32>
    %7 = arith.divf %5, %6 : vector<16x1xf32>
    %8 = vector.broadcast %7 : vector<16x1xf32> to vector<16x32xf32>
    %9 = arith.subf %2, %8 : vector<16x32xf32>
    %10 = arith.mulf %9, %9 : vector<16x32xf32>
    %cst_6 = arith.constant dense<0.000000e+00> : vector<16xf32>
    %11 = vector.multi_reduction <add>, %10, %cst_6 [1] : vector<16x32xf32> to vector<16xf32>
    %12 = vector.shape_cast %11 : vector<16xf32> to vector<16x1xf32>
    %cst_7 = arith.constant 3.200000e+01 : f32
    %13 = vector.broadcast %cst_7 : f32 to vector<16x1xf32>
    %14 = arith.divf %12, %13 : vector<16x1xf32>
    %cst_8 = arith.constant 9.99999974E-6 : f32
    %15 = vector.broadcast %cst_8 : f32 to vector<16x1xf32>
    %16 = arith.addf %14, %15 : vector<16x1xf32>
    %17 = math.rsqrt %16 : vector<16x1xf32>
    %18 = vector.broadcast %17 : vector<16x1xf32> to vector<16x32xf32>
    %19 = arith.mulf %9, %18 : vector<16x32xf32>
    %c0_9 = arith.constant 0 : index
    %c0_10 = arith.constant 0 : index
    %20 = vector.load %arg3[%c0_9, %c0_10] : memref<1x32xf32, #tpu.memory_space<vmem>>, vector<1x32xf32>
    %21 = vector.broadcast %20 : vector<1x32xf32> to vector<16x32xf32>
    %22 = arith.mulf %19, %21 : vector<16x32xf32>
    %c0_11 = arith.constant 0 : index
    %c0_12 = arith.constant 0 : index
    %23 = vector.load %arg4[%c0_11, %c0_12] : memref<1x32xf32, #tpu.memory_space<vmem>>, vector<1x32xf32>
    %24 = vector.broadcast %23 : vector<1x32xf32> to vector<16x32xf32>
    %25 = arith.addf %22, %24 : vector<16x32xf32>
    %c0_13 = arith.constant 0 : index
    %c0_14 = arith.constant 0 : index
    %26 = vector.load %arg5[%c0_13, %c0_14] : memref<32x32xf32, #tpu.memory_space<vmem>>, vector<32x32xf32>
    %cst_15 = arith.constant dense<0.000000e+00> : vector<16x32xf32>
    %27 = tpu.matmul %25, %26, %cst_15 {dimension_numbers = #tpu.dot_dimension_numbers<[1], [0], [0], [1], [0, 0, 1, 1], [], []>} : vector<16x32xf32>, vector<32x32xf32>, vector<16x32xf32> -> vector<16x32xf32>
    %c0_16 = arith.constant 0 : index
    %c0_17 = arith.constant 0 : index
    %28 = vector.load %arg6[%c0_16, %c0_17] : memref<1x32xf32, #tpu.memory_space<vmem>>, vector<1x32xf32>
    %29 = vector.broadcast %28 : vector<1x32xf32> to vector<16x32xf32>
    %30 = arith.addf %27, %29 : vector<16x32xf32>
    %c0_18 = arith.constant 0 : index
    %c0_19 = arith.constant 0 : index
    %31 = vector.load %arg7[%c0_18, %c0_19] : memref<16x32xf32, #tpu.memory_space<vmem>>, vector<16x32xf32>
    tpu.vector_store %arg7[%c0_18, %c0_19], %30 {strides = array<i32>} : memref<16x32xf32, #tpu.memory_space<vmem>>, vector<16x32xf32>,
    return
  }
  func.func @transform_0(%arg0: i32) -> (i32, i32) {
    %c0_i32 = arith.constant 0 : i32
    %c0_i32_0 = arith.constant 0 : i32
    return %arg0, %c0_i32 : i32, i32
  }
  func.func @transform_1(%arg0: i32) -> (i32, i32) {
    %c0_i32 = arith.constant 0 : i32
    %c0_i32_0 = arith.constant 0 : i32
    return %arg0, %c0_i32 : i32, i32
  }
  func.func @transform_2(%arg0: i32) -> (i32, i32) {
    %c0_i32 = arith.constant 0 : i32
    %c0_i32_0 = arith.constant 0 : i32
    %c0_i32_1 = arith.constant 0 : i32
    return %c0_i32, %c0_i32_0 : i32, i32
  }
  func.func @transform_3(%arg0: i32) -> (i32, i32) {
    %c0_i32 = arith.constant 0 : i32
    %c0_i32_0 = arith.constant 0 : i32
    %c0_i32_1 = arith.constant 0 : i32
    return %c0_i32, %c0_i32_0 : i32, i32
  }
  func.func @transform_4(%arg0: i32) -> (i32, i32) {
    %c0_i32 = arith.constant 0 : i32
    %c0_i32_0 = arith.constant 0 : i32
    %c0_i32_1 = arith.constant 0 : i32
    return %c0_i32, %c0_i32_0 : i32, i32
  }
  func.func @transform_5(%arg0: i32) -> (i32, i32) {
    %c0_i32 = arith.constant 0 : i32
    %c0_i32_0 = arith.constant 0 : i32
    %c0_i32_1 = arith.constant 0 : i32
    return %c0_i32, %c0_i32_0 : i32, i32
  }
  func.func @transform_6(%arg0: i32) -> (i32, i32) {
    %c0_i32 = arith.constant 0 : i32
    %c0_i32_0 = arith.constant 0 : i32
    return %arg0, %c0_i32 : i32, i32
  }
  func.func @transform_7(%arg0: i32) -> (i32, i32) {
    %c0_i32 = arith.constant 0 : i32
    %c0_i32_0 = arith.constant 0 : i32
    return %arg0, %c0_i32 : i32, i32
  }
}

</mosaic_0001>

<bundles_post_ra>
// kernel: tpu_custom_call.1
= control target key start
LH: loop header
LB: loop body
LE: loop exit
PB: predicated region body
PF: predicated region fallthrough
CT: control target
= control target key end

     0   :  { %6 = vsyncpa [#allocation3], 0  ;;  %s102_s0 = inlined_call_operand.hbm [shape: f32[8,128], index: 0, kind: input, shape index: {}]   ;;  %s103_s1 = inlined_call_operand.hbm [shape: f32[8,128], index: 1, kind: output, shape index: {}]  }
   0x1   :  { %7 = vsyncpa [#allocation4], 0  ;;  %s84_s6 = smov [#allocation2]  }
   0x2   :  { %s14_s7 = sshll.u32 %s84_s6, 4  ;;  %s15_s7 = int_to_ptr.vmem [resolvable:$true] %s14_s7 }
   0x3   :  { %s48_s8 = scalar_lea.vmem %s15_s7, 128  ;;  %p53_p1 = scmp.lt.s32.totalorder %s15_s7, %s15_s7 }
   0x4   :  { %p49_p0 = scmp.ne.s32.totalorder %s15_s7, %s48_s8  ;;  %p54_p2 = scmp.lt.s32.totalorder %s48_s8, %s48_s8 }
   0x6   :  { %p55_p3 = por %p54_p2, %p53_p1 }
   0x8   :  { %p56_p4 = pnand %p55_p3, %p49_p0 }
   0xa   :  { %59 = shalt.err (!%p56_p4)
}
   0xb   :  { %17 = dma.hbm_to_vmem [thread:$0]  %s102_s0, 128, %s15_s7, [#allocation3]  }
   0xc   :  { %80 = dma.done.wait [#allocation3], 128  }
   0xd   :  { %81 = vsyncadd [#allocation3], 4294967168  ;;  %s85_s11 = smov [#allocation5]   ;;  %v21_v0 = vld [vmem:[#allocation2] sm:$0xff] }
   0xe   :  { %s29_s12 = sshll.u32 %s85_s11, 4  ;;  %22 = vst [vmem:[#allocation5] sm:$0xff] %v21_v0  ;;  %s30_s12 = int_to_ptr.vmem [resolvable:$true] %s29_s12 }
   0xf   :  { %s60_s13 = scalar_lea.vmem %s30_s12, 128  ;;  %p65_p6 = scmp.lt.s32.totalorder %s30_s12, %s30_s12 }
  0x10   :  { %p61_p5 = scmp.ne.s32.totalorder %s30_s12, %s60_s13  ;;  %p66_p7 = scmp.lt.s32.totalorder %s60_s13, %s60_s13 }
  0x12   :  { %p67_p8 = por %p66_p7, %p65_p6 }
  0x14   :  { %p68_p9 = pnand %p67_p8, %p61_p5 }
  0x16   :  { %71 = shalt.err (!%p68_p9)
}
  0x17   :  { %32 = dma.vmem_to_hbm [thread:$0]  %s30_s12, 128, %s103_s1, [#allocation4]  }
  0x18   :  { %82 = dma.done.wait [#allocation4], 128  }
  0x19   :  { %83 = vsyncadd [#allocation4], 4294967168 }
  0x1a   :  { %36 = vsyncpa [#allocation3], 1 }
  0x1b   :  { %37 = vsyncpa [#allocation4], 1 }

// kernel: tpu_custom_call.1
= control target key start
LH: loop header
LB: loop body
LE: loop exit
PB: predicated region body
PF: predicated region fallthrough
CT: control target
= control target key end

     0   :  { %13 = vsyncpa [#allocation3], 0  ;;  %s491_s0 = inlined_call_operand.hbm [shape: f32[16,32], index: 0, kind: input, shape index: {}]   ;;  %s492_s1 = inlined_call_operand.hbm [shape: f32[16,32], index: 1, kind: input, shape index: {}, may-alias: {1,7}]   ;;  %s493_s2 = inlined_call_operand.vmem [shape: f32[1,32], index: 2, kind: input, shape index: {}]   ;;  %s494_s3 = inlined_call_operand.vmem [shape: f32[1,32], index: 3, kind: input, shape index: {}]   ;;  %s495_s4 = inlined_call_operand.vmem [shape: f32[32,32], index: 4, kind: input, shape index: {}]   ;;  %s496_s5 = inlined_call_operand.hbm [shape: f32[1,32], index: 5, kind: input, shape index: {}]   ;;  %s497_s6 = inlined_call_operand.hbm [shape: f32[16,32], index: 6, kind: output, shape index: {0}]   ;;  %s498_s7 = inlined_call_operand.hbm [shape: f32[16,32], index: 7, kind: output, shape index: {1}, may-alias: {1,7}]  }
   0x1   :  { %14 = vsyncpa [#allocation6], 0 }
   0x2   :  { %15 = vsyncpa [#allocation4], 0 }
   0x3   :  { %16 = vsyncpa [#allocation10], 0  ;;  %s389_s24 = smov [#allocation5]   ;;  %s390_s26 = smov [#allocation2]  }
   0x4   :  { %s34_s25 = sshll.u32 %s389_s24, 4  ;;  %s22_s27 = sshll.u32 %s390_s26, 4  ;;  %s35_s25 = int_to_ptr.vmem [resolvable:$true] %s34_s25  ;;  %s23_s27 = int_to_ptr.vmem [resolvable:$true] %s22_s27 }
   0x5   :  { %s289_s28 = scalar_lea.vmem %s35_s25, 256  ;;  %p294_p1 = scmp.lt.s32.totalorder %s35_s25, %s35_s25 }
   0x6   :  { %p290_p0 = scmp.ne.s32.totalorder %s35_s25, %s289_s28  ;;  %p295_p2 = scmp.lt.s32.totalorder %s289_s28, %s289_s28 }
   0x8   :  { %p296_p3 = por %p295_p2, %p294_p1 }
   0xa   :  { %p297_p4 = pnand %p296_p3, %p290_p0 }
   0xc   :  { %300 = shalt.err (!%p297_p4)
}
   0xd   :  { %s391_s29 = smov 128   ;;  %s392_s30 = smov 8  }
   0xe   :  { %40 = dma.hbm_to_vmem [thread:$0]  %s492_s1, 256, %s35_s25, [#allocation6], %s391_s29, %s391_s29, %s392_s30  }
   0xf   :  { %s309_s10 = scalar_lea.vmem %s23_s27, 256  ;;  %p314_p6 = scmp.lt.s32.totalorder %s23_s27, %s23_s27 }
  0x10   :  { %p310_p5 = scmp.ne.s32.totalorder %s23_s27, %s309_s10  ;;  %p315_p7 = scmp.lt.s32.totalorder %s309_s10, %s309_s10 }
  0x12   :  { %p316_p8 = por %p315_p7, %p314_p6 }
  0x14   :  { %p317_p9 = pnand %p316_p8, %p310_p5 }
  0x16   :  { %320 = shalt.err (!%p317_p9)
}
  0x17   :  { %28 = dma.hbm_to_vmem [thread:$0]  %s491_s0, 256, %s23_s27, [#allocation3], %s391_s29, %s391_s29, %s392_s30  }
  0x18   :  { %s393_s13 = smov [#allocation7]  }
  0x19   :  { %s53_s14 = sshll.u32 %s393_s13, 4  ;;  %s54_s14 = int_to_ptr.vmem [resolvable:$true] %s53_s14 }
  0x1a   :  { %s329_s15 = scalar_lea.vmem %s54_s14, 16  ;;  %s333_s1 = scalar_lea.vmem %s54_s14, 32 }
  0x1b   :  { %p330_p10 = scmp.ne.s32.totalorder %s54_s14, %s329_s15  ;;  %p334_p11 = scmp.lt.s32.totalorder %s54_s14, %s54_s14 }
  0x1c   :  { %p335_p12 = scmp.lt.s32.totalorder %s333_s1, %s329_s15 }
  0x1e   :  { %p336_p13 = por %p335_p12, %p334_p11 }
  0x20   :  { %p337_p0 = pnand %p336_p13, %p330_p10 }
  0x22   :  { %340 = shalt.err (!%p337_p0)
}
  0x23   :  { %56 = dma.hbm_to_vmem [thread:$0]  %s496_s5, 16, %s54_s14, [#allocation6]  }
  0x24   :  { %381 = dma.done.wait [#allocation3], 256  }
  0x25   :  { %382 = vsyncadd [#allocation3], 4294967040 }
  0x26   :  { %383 = dma.done.wait [#allocation6], 272  }
  0x27   :  { %384 = vsyncadd [#allocation6], 4294967024  ;;  %v66_v0 = vld [vmem:[#allocation5] sm:$0xff]  ;;  %v68_v1 = vld [vmem:[#allocation2] sm:$0xff]  ;;  %vm72_vm0 = vcmask 261120  }
  0x28   :  { %v67_v2 = vld [vmem:[#allocation5 + $0x8] sm:$0xff]  ;;  %v70_v3 = vadd.f32 %v68_v1, %v66_v0  ;;  %v69_v4 = vld [vmem:[#allocation2 + $0x8] sm:$0xff]  ;;  %v122_v19 = vld [vmem:[%s495_s4 + $0x10] sm:$0xff] }
  0x29   :  { %v71_v5 = vadd.f32 %v69_v4, %v67_v2  ;;  %v123_v18 = vld [vmem:[%s495_s4 + $0x18] sm:$0xff]  ;;  %v121_v20 = vld [vmem:[%s495_s4 + $0x8] sm:$0xff]  ;;  %v120_v21 = vld [vmem:[%s495_s4] sm:$0xff]  ;;  %s394_s4 = smov [#allocation9]  }
  0x2a   :  { %v75_v6 = vsel %vm72_vm0, %v70_v3, 0.0  ;;  %73 = vst.msk [vmem:[#allocation9] sm:$0xff] %vm72_vm0, %v70_v3  ;;  %259 = vmatprep.subr.mxu0 %v123_v18  ;;  %v248_v29 = vld [vmem:[%s493_s2] ss:$0 sm:$0xff]  ;;  %s231_s28 = sshll.u32 %s394_s4, 4  ;;  %s232_s28 = int_to_ptr.vmem [resolvable:$true] %s231_s28 }
  0x2b   :  { %76 = vadd.xlane.f32.xlu0 %v75_v6  ;;  %74 = vst.msk [vmem:[#allocation9 + $0x8] sm:$0xff] %vm72_vm0, %v71_v5  ;;  %v78_v7 = vsel %vm72_vm0, %v71_v5, 0.0  ;;  %260 = vmatpush3.msra.mxu0 %v123_v18  ;;  %v249_v31 = vld [vmem:[%s494_s3] ss:$0 sm:$0xff]  ;;  %s341_s8 = scalar_lea.vmem %s232_s28, 256  ;;  %p346_p2 = scmp.lt.s32.totalorder %s232_s28, %s232_s28 }
  0x2c   :  { %261 = vmatprep.subr.mxu0 %v122_v19  ;;  %p342_p1 = scmp.ne.s32.totalorder %s232_s28, %s341_s8  ;;  %p347_p3 = scmp.lt.s32.totalorder %s341_s8, %s341_s8 }
  0x2d   :  { %262 = vmatpush3.msra.mxu0 %v122_v19 }
  0x2e   :  { %263 = vmatprep.subr.mxu0 %v121_v20  ;;  %p348_p4 = por %p347_p3, %p346_p2 }
  0x2f   :  { %79 = vadd.xlane.f32.xlu0 %v78_v7  ;;  %264 = vmatpush3.msra.mxu0 %v121_v20 }
  0x30   :  { %265 = vmatprep.subr.mxu0 %v120_v21  ;;  %p349_p5 = pnand %p348_p4, %p342_p1 }
  0x31   :  { %266 = vmatpush3.msra.mxu0 %v120_v21 }
  0xb4   :  { %v77_v8 = vpop.xlane.xlu0 %76 }
  0xb5   :  { %v82_v9 = vmul.f32 0.03125, %v77_v8 }
  0xb7   :  { %v84_v10 = vsub.f32 %v70_v3, %v82_v9 }
  0xb8   :  { %v80_v11 = vpop.xlane.xlu0 %79 }
  0xb9   :  { %v83_v12 = vmul.f32 0.03125, %v80_v11  ;;  %v86_v13 = vmul.f32 %v84_v10, %v84_v10 }
  0xbb   :  { %v85_v14 = vsub.f32 %v71_v5, %v83_v12  ;;  %v88_v15 = vsel %vm72_vm0, %v86_v13, 0.0 }
  0xbc   :  { %89 = vadd.xlane.f32.xlu1 %v88_v15 }
  0xbd   :  { %v87_v16 = vmul.f32 %v85_v14, %v85_v14 }
  0xbf   :  { %v91_v17 = vsel %vm72_vm0, %v87_v16, 0.0 }
  0xc0   :  { %92 = vadd.xlane.f32.xlu1 %v91_v17 }
 0x145   :  { %v90_v22 = vpop.xlane.xlu1 %89 }
 0x146   :  { %v94_v23 = vmul.f32 0.03125, %v90_v22 }
 0x148   :  { %v96_v24 = vadd.f32 1e-05, %v94_v23 }
 0x149   :  { %v93_v25 = vpop.xlane.xlu1 %92 }
 0x14a   :  { %277 = vrsqrt.f32 %v96_v24  ;;  %v95_v26 = vmul.f32 0.03125, %v93_v25 }
 0x14c   :  { %v97_v27 = vadd.f32 1e-05, %v95_v26 }
 0x14e   :  { %279 = vrsqrt.f32 %v97_v27 }
 0x157   :  { %v278_v28 = vpop.eup %277 }
 0x158   :  { %v100_v30 = vmul.f32 %v278_v28, %v84_v10 }
 0x15a   :  { %v109_v32 = vmul.f32 %v248_v29, %v100_v30 }
 0x15b   :  { %v280_v33 = vpop.eup %279 }
 0x15c   :  { %v101_v34 = vmul.f32 %v280_v33, %v85_v14  ;;  %v118_v35 = vadd.f32 %v249_v31, %v109_v32 }
 0x15e   :  { %v110_v36 = vmul.f32 %v248_v29, %v101_v34  ;;  %267 = vmatprep.mubr.msk.f32.mxu0 %vm72_vm0, %v118_v35 }
 0x160   :  { %v119_v37 = vadd.f32 %v249_v31, %v110_v36 }
 0x162   :  { %268 = vmatmul.mubr.msk.f32.vlgmr.msra.gmra.mxu0 %vm72_vm0, %v119_v37 }
 0x163   :  { %352 = shalt.err (!%p349_p5)
}
 0x164   :  { %237 = dma.vmem_to_hbm [thread:$0]  %s232_s28, 256, %s498_s7, [#allocation10], %s391_s29, %s391_s29, %s392_s30   ;;  %v250_v38 = vld [vmem:[#allocation7] ss:$0 sm:$0xff] }
 0x165   :  { %s395_s9 = smov [#allocation8]  }
 0x166   :  { %s219_s10 = sshll.u32 %s395_s9, 4  ;;  %s220_s10 = int_to_ptr.vmem [resolvable:$true] %s219_s10 }
 0x167   :  { %s361_s11 = scalar_lea.vmem %s220_s10, 256  ;;  %p366_p7 = scmp.lt.s32.totalorder %s220_s10, %s220_s10 }
 0x168   :  { %p362_p6 = scmp.ne.s32.totalorder %s220_s10, %s361_s11  ;;  %p367_p8 = scmp.lt.s32.totalorder %s361_s11, %s361_s11 }
 0x16a   :  { %p368_p9 = por %p367_p8, %p366_p7 }
 0x16c   :  { %p369_p10 = pnand %p368_p9, %p362_p6 }
 0x222   :  { %v269_v39 = vpop.f32.mrf.mxu0 }
 0x223   :  { %v209_v40 = vadd.f32 %v269_v39, %v250_v38 }
 0x224   :  { %v203_v41 = vpop.f32.mrf.mxu0 }
 0x225   :  { %213 = vst.msk [vmem:[#allocation8 + $0x8] sm:$0xff] %vm72_vm0, %v209_v40  ;;  %v204_v42 = vadd.f32 %v250_v38, %v203_v41 }
 0x227   :  { %212 = vst.msk [vmem:[#allocation8] sm:$0xff] %vm72_vm0, %v204_v42 }
 0x228   :  { %372 = shalt.err (!%p369_p10)
}
 0x229   :  { %225 = dma.vmem_to_hbm [thread:$0]  %s220_s10, 256, %s497_s6, [#allocation4], %s391_s29, %s391_s29, %s392_s30  }
 0x22a   :  { %385 = dma.done.wait [#allocation4], 256  }
 0x22b   :  { %386 = vsyncadd [#allocation4], 4294967040 }
 0x22c   :  { %387 = dma.done.wait [#allocation10], 256  }
 0x22d   :  { %388 = vsyncadd [#allocation10], 4294967040 }
 0x22e   :  { %244 = vsyncpa [#allocation3], 1 }
 0x22f   :  { %245 = vsyncpa [#allocation6], 1 }
 0x230   :  { %246 = vsyncpa [#allocation4], 1 }
 0x231   :  { %247 = vsyncpa [#allocation10], 1 }

</bundles_post_ra>
